<compile_context>
chip_gen: v7x
topology: tpu7x:2x2x1
jax: 0.10.0
libtpu: 0.0.40
codegen_flags: <defaults>
</compile_context>

<pallas_src>
import math

import jax
import jax.numpy as jnp
from jax.experimental import pallas as pl
from jax.experimental.pallas import tpu as pltpu


_NEG_BIG = -1.0e30  # finite "-inf": exp underflows to 0, never produces NaN


# --------------------------------------------------------------------------
# Kernels
# --------------------------------------------------------------------------
def _finish_probs(logits, maskf, o_ref):
    """Additive finite mask -> softmax -> exact-zero masked probs."""
    logits = logits + maskf * _NEG_BIG
    m = jnp.max(logits, axis=-1, keepdims=True)
    e = jnp.exp(logits - m)
    s = jnp.sum(e, axis=-1, keepdims=True)
    inv = pl.reciprocal(s, approx=True)      # EUP slot (otherwise idle)
    inv = inv * (2.0 - s * inv)              # one Newton step -> ~f32 accuracy
    o_ref[...] = (e * inv * (1.0 - maskf)).astype(o_ref.dtype)


def _decoder_kernel_onehot(node_ref, emb_ref, sup_ref, dem_ref, rl_ref,
                           w_emb_ref, w_sup_ref, w_dem_ref, w_rl_ref, b_ref,
                           mask_ref, o_ref):
    """Fallback path for small num_nodes: in-kernel one-hot gather."""
    f32 = jnp.float32
    bt = node_ref.shape[0]
    n_nodes = emb_ref.shape[1]

    node = node_ref[...]                                           # [Bt, 1]
    iota = jax.lax.broadcasted_iota(jnp.int32, (bt, n_nodes), 1)   # [Bt, nn]
    onehot = (iota == node).astype(f32)                            # [Bt, nn]

    curr_emb = jnp.sum(onehot[:, :, None] * emb_ref[...].astype(f32), axis=1)
    curr_sup = jnp.sum(onehot[:, :, None] * sup_ref[...].astype(f32), axis=1)

    logits = (
        jnp.dot(curr_emb, w_emb_ref[...].astype(f32),
                preferred_element_type=f32)
        + jnp.dot(curr_sup, w_sup_ref[...].astype(f32),
                  preferred_element_type=f32)
        + jnp.dot(dem_ref[...].astype(f32), w_dem_ref[...].astype(f32),
                  preferred_element_type=f32)
        + rl_ref[...].astype(f32) * w_rl_ref[...].astype(f32)     # rank-1 FMA
        + b_ref[...]
    )                                                              # [Bt, Dp]
    _finish_probs(logits, mask_ref[...], o_ref)


def _decoder_kernel_gathered(ce_ref, cs_ref, dem_ref, rl_ref,
                             w_emb_ref, w_sup_ref, w_dem_ref, w_rl_ref, b_ref,
                             mask_ref, o_ref):
    """Main path: current-node rows were already DMA-gathered upstream."""
    f32 = jnp.float32
    logits = (
        jnp.dot(ce_ref[...], w_emb_ref[...], preferred_element_type=f32)
        + jnp.dot(cs_ref[...], w_sup_ref[...], preferred_element_type=f32)
        + jnp.dot(dem_ref[...], w_dem_ref[...], preferred_element_type=f32)
        + rl_ref[...].astype(f32) * w_rl_ref[...].astype(f32)
        + b_ref[...]
    )
    _finish_probs(logits, mask_ref[...], o_ref)


def _gather_kernel(node_ref, emb_row_ref, sup_row_ref, ce_ref, cs_ref):
    # node_ref is consumed by the data-dependent index_maps (scalar prefetch);
    # the body just forwards the single DMA'd node row to the gathered output.
    del node_ref
    ce_ref[...] = emb_row_ref[...]
    cs_ref[...] = sup_row_ref[...]


# --------------------------------------------------------------------------
# One-time parameter preparation (hoist out of the decode loop)
# --------------------------------------------------------------------------
def prepare_decoder_params(W, b, *, emb_dim, num_items, dtype=jnp.float32):
    """Split/pad/cast the Linear weight once; reuse across decode steps."""
    f32 = jnp.float32
    E, N = emb_dim, num_items
    Din, Dout = W.shape
    assert Din == E + 2 * N + 1 and Dout == N + 1
    Dout_pad = ((Dout + 127) // 128) * 128   # lane-dense output width
    pad = Dout_pad - Dout
    Wp = jnp.pad(W.astype(dtype), ((0, 0), (0, pad)))
    return dict(
        w_emb=Wp[:E],
        w_sup=Wp[E:E + N],
        w_dem=Wp[E + N:E + 2 * N],
        w_rl=Wp[E + 2 * N:E + 2 * N + 1],
        b=jnp.pad(b.astype(f32).reshape(1, Dout), ((0, 0), (0, pad))),
        dtype=dtype, E=E, N=N, Dout=Dout, Dout_pad=Dout_pad,
    )


# --------------------------------------------------------------------------
# Batch-tile selection from a VMEM byte budget
# --------------------------------------------------------------------------
def _choose_bt(B, per_row_bytes, const_bytes, vmem_budget_bytes):
    avail = max(vmem_budget_bytes - const_bytes, 16 * per_row_bytes)
    bt = int(avail // (2 * per_row_bytes))        # inputs/outputs double-buffered
    bt = max(8, min(bt, B, 1024))
    bt = max(8, (bt // 8) * 8)                    # sublane-friendly
    if B >= 16:
        # Force >= 2 grid tiles so the "parallel" batch axis can shard across
        # v7x's two TensorCores (grid=(1,) would pin all work on one core).
        half = max(8, (((B + 1) // 2 + 7) // 8) * 8)
        bt = min(bt, half)
    return bt


# --------------------------------------------------------------------------
# Per-step wrapper
# --------------------------------------------------------------------------
def softmax_item_decoder(embeddings, supply_w_depot, demand, remaining_load,
                         node, mask, params, *,
                         return_padded=False,
                         vmem_budget_bytes=20 * 1024 * 1024,
                         onehot_max_num_nodes=16):
    """Fused Pallas implementation of SoftmaxItemDecoder.forward.

    embeddings:      [B, num_nodes, E]
    supply_w_depot:  [B, num_nodes, N]
    demand:          [B, N]
    remaining_load:  [B, 1]
    node:            [B] int   current node index
    mask:            [B, N+1]  bool (True => prob forced to 0)
    params:          output of prepare_decoder_params (weights pre-split/padded)
    returns probs:   [B, N+1] f32 (or [B, Dout_pad] if return_padded=True,
                     padded columns are exact zeros)
    """
    f32 = jnp.float32
    act_dtype = params["dtype"]
    act_bytes = jnp.dtype(act_dtype).itemsize
    E, N = params["E"], params["N"]
    Dout, Dout_pad = params["Dout"], params["Dout_pad"]
    B, num_nodes, _ = embeddings.shape

    emb = embeddings.astype(act_dtype)
    sup = supply_w_depot.astype(act_dtype)
    dem = demand.astype(act_dtype)
    rl = remaining_load.reshape(B, 1).astype(act_dtype)
    node_i = node.reshape(B).astype(jnp.int32)

    use_gather = num_nodes >= onehot_max_num_nodes

    if use_gather:
        # Scalar-prefetched data-dependent gather: only the selected node row
        # of the two big [B, num_nodes, *] tensors crosses HBM -> VMEM
        # (~num_nodes x less HBM traffic than streaming + one-hot reducing).
        ce3, cs3 = pl.pallas_call(
            _gather_kernel,
            out_shape=(jax.ShapeDtypeStruct((B, 1, E), act_dtype),
                       jax.ShapeDtypeStruct((B, 1, N), act_dtype)),
            grid_spec=pltpu.PrefetchScalarGridSpec(
                num_scalar_prefetch=1,
                grid=(B,),
                in_specs=[pl.BlockSpec((1, 1, E), lambda i, nd: (i, nd[i], 0)),
                          pl.BlockSpec((1, 1, N), lambda i, nd: (i, nd[i], 0))],
                out_specs=[pl.BlockSpec((1, 1, E), lambda i, nd: (i, 0, 0)),
                           pl.BlockSpec((1, 1, N), lambda i, nd: (i, 0, 0))]),
            compiler_params=pltpu.CompilerParams(
                dimension_semantics=("arbitrary",)),
        )(node_i, emb, sup)
        curr_emb = ce3.reshape(B, E)
        curr_sup = cs3.reshape(B, N)
        per_row = (E + 2 * N + 1) * act_bytes + 2 * Dout_pad * 4
    else:
        per_row = (4 + (num_nodes * (E + N) + N + 1) * act_bytes
                   + 2 * Dout_pad * 4)

    # Weights/bias are resident (constant index_map); count their default
    # double-buffering against the budget instead of single-buffering them.
    const_bytes = 2 * ((E + 2 * N + 1) * Dout_pad * act_bytes + Dout_pad * 4)
    bt = _choose_bt(B, per_row, const_bytes, vmem_budget_bytes)
    grid_n = -(-B // bt)
    B_pad = grid_n * bt
    pad_r = B_pad - B
    pad_c = Dout_pad - Dout

    # 1.0 = masked; padded columns AND padded batch rows are always masked.
    mask_f = jnp.pad(mask.astype(f32), ((0, pad_r), (0, pad_c)),
                     constant_values=1.0)
    dem_p = jnp.pad(dem, ((0, pad_r), (0, 0)))
    rl_p = jnp.pad(rl, ((0, pad_r), (0, 0)))

    w_args = (params["w_emb"], params["w_sup"], params["w_dem"],
              params["w_rl"], params["b"])
    wspec = lambda rows: pl.BlockSpec((rows, Dout_pad), lambda i: (0, 0))
    bspec = lambda last: pl.BlockSpec((bt, last), lambda i: (i, 0))
    w_specs = [wspec(E), wspec(N), wspec(N), wspec(1), wspec(1)]

    cost = pl.CostEstimate(
        flops=int(2 * B_pad * (E + 2 * N) * Dout_pad + 10 * B_pad * Dout_pad
                  + (0 if use_gather else 2 * B_pad * num_nodes * (E + N))),
        transcendentals=int(B_pad * Dout_pad + B_pad),
        bytes_accessed=int(B_pad * per_row + const_bytes // 2),
    )
    cparams = pltpu.CompilerParams(
        dimension_semantics=("parallel",),
        vmem_limit_bytes=32 * 1024 * 1024)

    if use_gather:
        ce_p = jnp.pad(curr_emb, ((0, pad_r), (0, 0)))
        cs_p = jnp.pad(curr_sup, ((0, pad_r), (0, 0)))
        probs_pad = pl.pallas_call(
            _decoder_kernel_gathered,
            out_shape=jax.ShapeDtypeStruct((B_pad, Dout_pad), f32),
            grid=(grid_n,),
            in_specs=[bspec(E), bspec(N), bspec(N), bspec(1),
                      *w_specs, bspec(Dout_pad)],
            out_specs=bspec(Dout_pad),
            compiler_params=cparams,
            cost_estimate=cost,
        )(ce_p, cs_p, dem_p, rl_p, *w_args, mask_f)
    else:
        node_col = jnp.pad(node_i, (0, pad_r)).reshape(B_pad, 1)
        emb_p = jnp.pad(emb, ((0, pad_r), (0, 0), (0, 0)))
        sup_p = jnp.pad(sup, ((0, pad_r), (0, 0), (0, 0)))
        probs_pad = pl.pallas_call(
            _decoder_kernel_onehot,
            out_shape=jax.ShapeDtypeStruct((B_pad, Dout_pad), f32),
            grid=(grid_n,),
            in_specs=[bspec(1),
                      pl.BlockSpec((bt, num_nodes, E), lambda i: (i, 0, 0)),
                      pl.BlockSpec((bt, num_nodes, N), lambda i: (i, 0, 0)),
                      bspec(N), bspec(1), *w_specs, bspec(Dout_pad)],
            out_specs=bspec(Dout_pad),
            compiler_params=cparams,
            cost_estimate=cost,
        )(node_col, emb_p, sup_p, dem_p, rl_p, *w_args, mask_f)

    if pad_r:
        probs_pad = probs_pad[:B]
    if return_padded:
        return probs_pad
    return probs_pad[:, :Dout]


# --------------------------------------------------------------------------
# Pure-JAX reference (mirrors the PyTorch module)
# --------------------------------------------------------------------------
def _reference(embeddings, supply_w_depot, demand, remaining_load, node, mask, W, b):
    B = embeddings.shape[0]
    idx = node.reshape(B, 1, 1)
    ce = jnp.take_along_axis(
        embeddings, jnp.broadcast_to(idx, (B, 1, embeddings.shape[-1])), axis=1
    )[:, 0, :]
    cs = jnp.take_along_axis(
        supply_w_depot, jnp.broadcast_to(idx, (B, 1, supply_w_depot.shape[-1])), axis=1
    )[:, 0, :]
    X = jnp.concatenate([ce, cs, demand, remaining_load], axis=-1)
    logits = X @ W + b
    logits = jnp.where(mask, -jnp.inf, logits)
    return jax.nn.softmax(logits, axis=-1)


if __name__ == "__main__":
    # Small synthetic shapes consistent with the module:
    B = 8             # batch
    num_items = 7     # num_skus  -> Dout = num_items + 1 = 8
    E = 32            # embedding_dim
    num_nodes = num_items + 2            # depot + item nodes
    Din = E + num_items + num_items + 1  # 47
    Dout = num_items + 1

    key = jax.random.PRNGKey(0)
    k1, k2, k3, k4, k5, k6, k7, k8 = jax.random.split(key, 8)

    embeddings = jax.random.normal(k1, (B, num_nodes, E), jnp.float32)
    supply_w_depot = jax.random.uniform(k2, (B, num_nodes, num_items), jnp.float32)
    demand = jax.random.uniform(k3, (B, num_items), jnp.float32)
    remaining_load = jax.random.uniform(k4, (B, 1), jnp.float32)
    node = jax.random.randint(k5, (B,), 0, num_nodes, jnp.int32)

    # Random item mask (never mask everything: keep column 0 always valid).
    mask = jax.random.bernoulli(k6, 0.3, (B, Dout))
    mask = mask.at[:, 0].set(False)

    # nn.Linear init: U(-1/sqrt(fan_in), 1/sqrt(fan_in))
    bound = 1.0 / math.sqrt(Din)
    W = jax.random.uniform(k7, (Din, Dout), jnp.float32, -bound, bound)
    b = jax.random.uniform(k8, (Dout,), jnp.float32, -bound, bound)

    # One-time weight prep (would live in model init in a decode loop).
    params = prepare_decoder_params(W, b, emb_dim=E, num_items=num_items,
                                    dtype=jnp.float32)

    # num_nodes=9 < 16 -> exercises the fused one-hot path; the scalar-prefetch
    # DMA-gather path is used automatically for larger num_nodes.
    probs_pad = softmax_item_decoder(
        embeddings, supply_w_depot, demand, remaining_load, node, mask, params,
        return_padded=True,
    )
    probs_pad = jax.block_until_ready(probs_pad)
    probs = probs_pad[:, :Dout]

    ref = _reference(
        embeddings, supply_w_depot, demand, remaining_load, node, mask, W, b
    )
    assert probs_pad.shape == (B, params["Dout_pad"])
    assert jnp.allclose(probs, ref, atol=1e-4, rtol=1e-4)
    # masked entries must be exactly zero probability
    assert jnp.all(jnp.where(mask, probs, 0.0) == 0.0)
    # padded columns must be exact zeros (safe to sample/argmax on the slab)
    assert jnp.all(probs_pad[:, Dout:] == 0.0)
    # rows remain valid distributions
    assert jnp.allclose(jnp.sum(probs, axis=-1), 1.0, atol=1e-4)

    print("KERNEL_OK")
</pallas_src>

<mosaic_0001>
module attributes {stable_mosaic.version = 11 : i64} {
  func.func @_decoder_kernel_onehot(%arg0: i32, %arg1: memref<8x1xi32, #tpu.memory_space<vmem>>, %arg2: memref<8x9x32xf32, #tpu.memory_space<vmem>>, %arg3: memref<8x9x7xf32, #tpu.memory_space<vmem>>, %arg4: memref<8x7xf32, #tpu.memory_space<vmem>>, %arg5: memref<8x1xf32, #tpu.memory_space<vmem>>, %arg6: memref<32x128xf32, #tpu.memory_space<vmem>>, %arg7: memref<7x128xf32, #tpu.memory_space<vmem>>, %arg8: memref<7x128xf32, #tpu.memory_space<vmem>>, %arg9: memref<1x128xf32, #tpu.memory_space<vmem>>, %arg10: memref<1x128xf32, #tpu.memory_space<vmem>>, %arg11: memref<8x128xf32, #tpu.memory_space<vmem>>, %arg12: memref<8x128xf32, #tpu.memory_space<vmem>>) attributes {dimension_semantics = [#tpu.dimension_semantics<parallel>], iteration_bounds = array<i64: 1>, scalar_prefetch = 0 : i64, scratch_operands = 0 : i64, tpu.core_type = #tpu.core_type<tc>, window_params = [{transform_indices = @transform_0, window_bounds = array<i64: 8, 1>}, {transform_indices = @transform_1, window_bounds = array<i64: 8, 9, 32>}, {transform_indices = @transform_2, window_bounds = array<i64: 8, 9, 7>}, {transform_indices = @transform_3, window_bounds = array<i64: 8, 7>}, {transform_indices = @transform_4, window_bounds = array<i64: 8, 1>}, {pipeline_mode = #tpu.pipeline_mode<synchronous>, transform_indices = @transform_5, window_bounds = array<i64: 32, 128>}, {pipeline_mode = #tpu.pipeline_mode<synchronous>, transform_indices = @transform_6, window_bounds = array<i64: 7, 128>}, {pipeline_mode = #tpu.pipeline_mode<synchronous>, transform_indices = @transform_7, window_bounds = array<i64: 7, 128>}, {pipeline_mode = #tpu.pipeline_mode<synchronous>, transform_indices = @transform_8, window_bounds = array<i64: 1, 128>}, {pipeline_mode = #tpu.pipeline_mode<synchronous>, transform_indices = @transform_9, window_bounds = array<i64: 1, 128>}, {transform_indices = @transform_10, window_bounds = array<i64: 8, 128>}, {transform_indices = @transform_11, window_bounds = array<i64: 8, 128>}]} {
    %c0 = arith.constant 0 : index
    %c0_0 = arith.constant 0 : index
    %0 = vector.load %arg1[%c0, %c0_0] : memref<8x1xi32, #tpu.memory_space<vmem>>, vector<8x1xi32>
    %1 = tpu.iota {dimensions = array<i32: 1>} : vector<8x9xi32>
    %2 = vector.broadcast %0 : vector<8x1xi32> to vector<8x9xi32>
    %3 = arith.cmpi eq, %1, %2 : vector<8x9xi32>
    %4 = arith.extui %3 : vector<8x9xi1> to vector<8x9xi32>
    %5 = arith.sitofp %4 : vector<8x9xi32> to vector<8x9xf32>
    %6 = vector.shape_cast %5 : vector<8x9xf32> to vector<8x9x1xf32>
    %c0_1 = arith.constant 0 : index
    %c0_2 = arith.constant 0 : index
    %c0_3 = arith.constant 0 : index
    %7 = vector.load %arg2[%c0_1, %c0_2, %c0_3] : memref<8x9x32xf32, #tpu.memory_space<vmem>>, vector<8x9x32xf32>
    %8 = vector.broadcast %6 : vector<8x9x1xf32> to vector<8x9x32xf32>
    %9 = arith.mulf %8, %7 : vector<8x9x32xf32>
    %cst = arith.constant dense<0.000000e+00> : vector<8x32xf32>
    %10 = vector.multi_reduction <add>, %9, %cst [1] : vector<8x9x32xf32> to vector<8x32xf32>
    %11 = vector.shape_cast %5 : vector<8x9xf32> to vector<8x9x1xf32>
    %c0_4 = arith.constant 0 : index
    %c0_5 = arith.constant 0 : index
    %c0_6 = arith.constant 0 : index
    %12 = vector.load %arg3[%c0_4, %c0_5, %c0_6] : memref<8x9x7xf32, #tpu.memory_space<vmem>>, vector<8x9x7xf32>
    %13 = vector.broadcast %11 : vector<8x9x1xf32> to vector<8x9x7xf32>
    %14 = arith.mulf %13, %12 : vector<8x9x7xf32>
    %cst_7 = arith.constant dense<0.000000e+00> : vector<8x7xf32>
    %15 = vector.multi_reduction <add>, %14, %cst_7 [1] : vector<8x9x7xf32> to vector<8x7xf32>
    %c0_8 = arith.constant 0 : index
    %c0_9 = arith.constant 0 : index
    %16 = vector.load %arg6[%c0_8, %c0_9] : memref<32x128xf32, #tpu.memory_space<vmem>>, vector<32x128xf32>
    %cst_10 = arith.constant dense<0.000000e+00> : vector<8x128xf32>
    %17 = tpu.matmul %10, %16, %cst_10 {dimension_numbers = #tpu.dot_dimension_numbers<[1], [0], [0], [1], [0, 0, 1, 1], [], []>} : vector<8x32xf32>, vector<32x128xf32>, vector<8x128xf32> -> vector<8x128xf32>
    %c0_11 = arith.constant 0 : index
    %c0_12 = arith.constant 0 : index
    %18 = vector.load %arg7[%c0_11, %c0_12] : memref<7x128xf32, #tpu.memory_space<vmem>>, vector<7x128xf32>
    %cst_13 = arith.constant dense<0.000000e+00> : vector<8x128xf32>
    %19 = tpu.matmul %15, %18, %cst_13 {dimension_numbers = #tpu.dot_dimension_numbers<[1], [0], [0], [1], [0, 0, 1, 1], [], []>} : vector<8x7xf32>, vector<7x128xf32>, vector<8x128xf32> -> vector<8x128xf32>
    %20 = arith.addf %17, %19 : vector<8x128xf32>
    %c0_14 = arith.constant 0 : index
    %c0_15 = arith.constant 0 : index
    %21 = vector.load %arg4[%c0_14, %c0_15] : memref<8x7xf32, #tpu.memory_space<vmem>>, vector<8x7xf32>
    %c0_16 = arith.constant 0 : index
    %c0_17 = arith.constant 0 : index
    %22 = vector.load %arg8[%c0_16, %c0_17] : memref<7x128xf32, #tpu.memory_space<vmem>>, vector<7x128xf32>
    %cst_18 = arith.constant dense<0.000000e+00> : vector<8x128xf32>
    %23 = tpu.matmul %21, %22, %cst_18 {dimension_numbers = #tpu.dot_dimension_numbers<[1], [0], [0], [1], [0, 0, 1, 1], [], []>} : vector<8x7xf32>, vector<7x128xf32>, vector<8x128xf32> -> vector<8x128xf32>
    %24 = arith.addf %20, %23 : vector<8x128xf32>
    %c0_19 = arith.constant 0 : index
    %c0_20 = arith.constant 0 : index
    %25 = vector.load %arg5[%c0_19, %c0_20] : memref<8x1xf32, #tpu.memory_space<vmem>>, vector<8x1xf32>
    %c0_21 = arith.constant 0 : index
    %c0_22 = arith.constant 0 : index
    %26 = vector.load %arg9[%c0_21, %c0_22] : memref<1x128xf32, #tpu.memory_space<vmem>>, vector<1x128xf32>
    %27 = vector.broadcast %25 : vector<8x1xf32> to vector<8x128xf32>
    %28 = vector.broadcast %26 : vector<1x128xf32> to vector<8x128xf32>
    %29 = arith.mulf %27, %28 : vector<8x128xf32>
    %30 = arith.addf %24, %29 : vector<8x128xf32>
    %c0_23 = arith.constant 0 : index
    %c0_24 = arith.constant 0 : index
    %31 = vector.load %arg10[%c0_23, %c0_24] : memref<1x128xf32, #tpu.memory_space<vmem>>, vector<1x128xf32>
    %32 = vector.broadcast %31 : vector<1x128xf32> to vector<8x128xf32>
    %33 = arith.addf %30, %32 : vector<8x128xf32>
    %c0_25 = arith.constant 0 : index
    %c0_26 = arith.constant 0 : index
    %34 = vector.load %arg11[%c0_25, %c0_26] : memref<8x128xf32, #tpu.memory_space<vmem>>, vector<8x128xf32>
    %cst_27 = arith.constant -1.000000e+30 : f32
    %35 = vector.broadcast %cst_27 : f32 to vector<8x128xf32>
    %36 = arith.mulf %34, %35 : vector<8x128xf32>
    %37 = arith.addf %33, %36 : vector<8x128xf32>
    %cst_28 = arith.constant dense<0xFF800000> : vector<8xf32>
    %38 = vector.multi_reduction <maximumf>, %37, %cst_28 [1] : vector<8x128xf32> to vector<8xf32>
    %39 = vector.shape_cast %38 : vector<8xf32> to vector<8x1xf32>
    %40 = vector.broadcast %39 : vector<8x1xf32> to vector<8x128xf32>
    %41 = arith.subf %37, %40 : vector<8x128xf32>
    %42 = math.exp %41 : vector<8x128xf32>
    %cst_29 = arith.constant dense<0.000000e+00> : vector<8xf32>
    %43 = vector.multi_reduction <add>, %42, %cst_29 [1] : vector<8x128xf32> to vector<8xf32>
    %44 = vector.shape_cast %43 : vector<8xf32> to vector<8x1xf32>
    %45 = tpu.reciprocal %44 {approx = true} : vector<8x1xf32> -> vector<8x1xf32>
    %46 = arith.mulf %44, %45 : vector<8x1xf32>
    %cst_30 = arith.constant 2.000000e+00 : f32
    %47 = vector.broadcast %cst_30 : f32 to vector<8x1xf32>
    %48 = arith.subf %47, %46 : vector<8x1xf32>
    %49 = arith.mulf %45, %48 : vector<8x1xf32>
    %50 = vector.broadcast %49 : vector<8x1xf32> to vector<8x128xf32>
    %51 = arith.mulf %42, %50 : vector<8x128xf32>
    %cst_31 = arith.constant 1.000000e+00 : f32
    %52 = vector.broadcast %cst_31 : f32 to vector<8x128xf32>
    %53 = arith.subf %52, %34 : vector<8x128xf32>
    %54 = arith.mulf %51, %53 : vector<8x128xf32>
    %c0_32 = arith.constant 0 : index
    %c0_33 = arith.constant 0 : index
    %55 = vector.load %arg12[%c0_32, %c0_33] : memref<8x128xf32, #tpu.memory_space<vmem>>, vector<8x128xf32>
    tpu.vector_store %arg12[%c0_32, %c0_33], %54 {strides = array<i32>} : memref<8x128xf32, #tpu.memory_space<vmem>>, vector<8x128xf32>,
    return
  }
  func.func @transform_0(%arg0: i32) -> (i32, i32) {
    %c0_i32 = arith.constant 0 : i32
    %c0_i32_0 = arith.constant 0 : i32
    return %arg0, %c0_i32 : i32, i32
  }
  func.func @transform_1(%arg0: i32) -> (i32, i32, i32) {
    %c0_i32 = arith.constant 0 : i32
    %c0_i32_0 = arith.constant 0 : i32
    %c0_i32_1 = arith.constant 0 : i32
    return %arg0, %c0_i32, %c0_i32_0 : i32, i32, i32
  }
  func.func @transform_2(%arg0: i32) -> (i32, i32, i32) {
    %c0_i32 = arith.constant 0 : i32
    %c0_i32_0 = arith.constant 0 : i32
    %c0_i32_1 = arith.constant 0 : i32
    return %arg0, %c0_i32, %c0_i32_0 : i32, i32, i32
  }
  func.func @transform_3(%arg0: i32) -> (i32, i32) {
    %c0_i32 = arith.constant 0 : i32
    %c0_i32_0 = arith.constant 0 : i32
    return %arg0, %c0_i32 : i32, i32
  }
  func.func @transform_4(%arg0: i32) -> (i32, i32) {
    %c0_i32 = arith.constant 0 : i32
    %c0_i32_0 = arith.constant 0 : i32
    return %arg0, %c0_i32 : i32, i32
  }
  func.func @transform_5(%arg0: i32) -> (i32, i32) {
    %c0_i32 = arith.constant 0 : i32
    %c0_i32_0 = arith.constant 0 : i32
    %c0_i32_1 = arith.constant 0 : i32
    return %c0_i32, %c0_i32_0 : i32, i32
  }
  func.func @transform_6(%arg0: i32) -> (i32, i32) {
    %c0_i32 = arith.constant 0 : i32
    %c0_i32_0 = arith.constant 0 : i32
    %c0_i32_1 = arith.constant 0 : i32
    return %c0_i32, %c0_i32_0 : i32, i32
  }
  func.func @transform_7(%arg0: i32) -> (i32, i32) {
    %c0_i32 = arith.constant 0 : i32
    %c0_i32_0 = arith.constant 0 : i32
    %c0_i32_1 = arith.constant 0 : i32
    return %c0_i32, %c0_i32_0 : i32, i32
  }
  func.func @transform_8(%arg0: i32) -> (i32, i32) {
    %c0_i32 = arith.constant 0 : i32
    %c0_i32_0 = arith.constant 0 : i32
    %c0_i32_1 = arith.constant 0 : i32
    return %c0_i32, %c0_i32_0 : i32, i32
  }
  func.func @transform_9(%arg0: i32) -> (i32, i32) {
    %c0_i32 = arith.constant 0 : i32
    %c0_i32_0 = arith.constant 0 : i32
    %c0_i32_1 = arith.constant 0 : i32
    return %c0_i32, %c0_i32_0 : i32, i32
  }
  func.func @transform_10(%arg0: i32) -> (i32, i32) {
    %c0_i32 = arith.constant 0 : i32
    %c0_i32_0 = arith.constant 0 : i32
    return %arg0, %c0_i32 : i32, i32
  }
  func.func @transform_11(%arg0: i32) -> (i32, i32) {
    %c0_i32 = arith.constant 0 : i32
    %c0_i32_0 = arith.constant 0 : i32
    return %arg0, %c0_i32 : i32, i32
  }
}

</mosaic_0001>

<bundles_post_ra>
// kernel: tpu_custom_call.1
= control target key start
LH: loop header
LB: loop body
LE: loop exit
PB: predicated region body
PF: predicated region fallthrough
CT: control target
= control target key end

     0   :  { %s1036_s0 = inlined_call_operand.vmem [shape: s32[8,1], index: 0, kind: input, shape index: {}]   ;;  %s1037_s1 = inlined_call_operand.vmem [shape: f32[8,9,32], index: 1, kind: input, shape index: {}]   ;;  %s1038_s2 = inlined_call_operand.vmem [shape: f32[8,9,7], index: 2, kind: input, shape index: {}]   ;;  %s1039_s3 = inlined_call_operand.vmem [shape: f32[8,7], index: 3, kind: input, shape index: {}]   ;;  %s1040_s4 = inlined_call_operand.vmem [shape: f32[8,1], index: 4, kind: input, shape index: {}]   ;;  %s1041_s5 = inlined_call_operand.vmem [shape: f32[32,128], index: 5, kind: input, shape index: {}]   ;;  %s1042_s6 = inlined_call_operand.vmem [shape: f32[7,128], index: 6, kind: input, shape index: {}]   ;;  %s1043_s7 = inlined_call_operand.vmem [shape: f32[7,128], index: 7, kind: input, shape index: {}]   ;;  %s1044_s8 = inlined_call_operand.vmem [shape: f32[1,128], index: 8, kind: input, shape index: {}]   ;;  %s1045_s9 = inlined_call_operand.vmem [shape: f32[1,128], index: 9, kind: input, shape index: {}]   ;;  %s1046_s10 = inlined_call_operand.vmem [shape: f32[8,128], index: 10, kind: input, shape index: {}]   ;;  %s1047_s11 = inlined_call_operand.hbm [shape: f32[8,128], index: 11, kind: output, shape index: {}]  }
   0x1   :  { %v39_v0 = vld [vmem:[%s1036_s0] sm:$0xff] }
   0x2   :  { %16 = vsyncpa [#allocation3], 0  ;;  %v751_v1 = vmov 0   ;;  %v752_v2 = vmov 0.0   ;;  %v40_v3 = vlaneseq  ;;  %v348_v24 = vld [vmem:[%s1041_s5] sm:$0xff]  ;;  %v349_v25 = vld [vmem:[%s1041_s5 + $0x8] sm:$0xff] }
   0x3   :  { %721 = vset.pattern.permute.xlu0 %v751_v1  ;;  %689 = vmatprep.subr.mxu0 %v752_v2  ;;  %v711_v26 = vpack.c.bf16 %v349_v25, %v348_v24  ;;  %v753_v27 = vmov 0.0|0.0   ;;  %v350_v28 = vld [vmem:[%s1041_s5 + $0x10] sm:$0xff]  ;;  %v351_v29 = vld [vmem:[%s1041_s5 + $0x18] sm:$0xff]  ;;  %v352_v30 = vld [vmem:[%s1042_s6] sm:$0x7f]  ;;  %vm377_vm1 = vcmask 1046528  }
   0x4   :  { %43 = vperm.xlu0 %721, %v39_v0   ;;  %722 = vset.pattern.permute.xlu1 %v751_v1  ;;  %v49_v4 = vshrl.u32 %v40_v3, 7  ;;  %v41_v5 = vand.u32 127, %v40_v3  ;;  %v714_v31 = vpack.c.bf16 %v351_v29, %v350_v28  ;;  %vm754_vm2 = vmmov 0   ;;  %v617_v32 = vld [vmem:[%s1040_s4] sm:$0xff]  ;;  %v137_v33 = vld [vmem:[%s1037_s1 + $0x8] sm:$0x1] }
   0x5   :  { %710 = vmatprep.subr.bf16.mxu1 %v753_v27  ;;  %690 = vmatpush3.msk.msra.mxu0 %vm377_vm1, %v352_v30  ;;  %v243_v34 = vld [vmem:[%s1038_s2 + $0x8] sm:$0x1]  ;;  %v136_v35 = vld [vmem:[%s1037_s1] sm:$0xff]  ;;  %vm170_vm3 = vcmask 253952   ;;  %vm276_vm4 = vcmask 49152   ;;  %vm168_vm5 = vcmask 261120  }
   0x6   :  { %v50_v6 = vsub.s32 0, %v49_v4  ;;  %v61_v10 = vsub.s32 1, %v49_v4  ;;  %v72_v12 = vsub.s32 2, %v49_v4  ;;  %v83_v14 = vsub.s32 3, %v49_v4  ;;  %712 = vmatpush3.bf16.msra.mxu1 %v711_v26  ;;  %691 = vmatprep.mubr.msk.f32.mxu0 %vm754_vm2, %v752_v2  ;;  %v242_v36 = vld [vmem:[%s1038_s2] sm:$0xff]  ;;  %v138_v43 = vld [vmem:[%s1037_s1 + $0x10] sm:$0xff] }
   0x7   :  { %v94_v16 = vsub.s32 4, %v49_v4  ;;  %v105_v18 = vsub.s32 5, %v49_v4  ;;  %v116_v20 = vsub.s32 6, %v49_v4  ;;  %v127_v22 = vsub.s32 7, %v49_v4  ;;  %713 = vmatprep.subr.bf16.mxu1 %v753_v27  ;;  %702 = vmatprep.mubr.msk.f32.mxu1 %vm754_vm2, %v752_v2  ;;  %v244_v44 = vld [vmem:[%s1038_s2 + $0x10] sm:$0xff]  ;;  %v140_v1 = vld [vmem:[%s1037_s1 + $0x20] sm:$0xff] }
   0x8   :  { %705 = vmatprep.subr.mxu0 %v752_v2  ;;  %vm274_vm6 = vcmask 56320   ;;  %v139_v45 = vld [vmem:[%s1037_s1 + $0x18] sm:$0x1]  ;;  %vm361_vm7 = vcmask 1041409   ;;  %vm363_vm8 = vcmask 1042434   ;;  %vm365_vm9 = vcmask 1043459  }
   0x9   :  { %v245_v46 = vld [vmem:[%s1038_s2 + $0x18] sm:$0x1]  ;;  %vm367_vm10 = vcmask 1044484   ;;  %vm369_vm11 = vcmask 1045509   ;;  %vm371_vm12 = vcmask 1046534   ;;  %vm373_vm13 = vcmask 1047559  }
   0xa   :  { %715 = vmatpush3.bf16.msra.mxu1 %v714_v31  ;;  %v143_v26 = vld [vmem:[%s1037_s1 + $0x38] sm:$0x1] }
   0xb   :  { %v249_v27 = vld [vmem:[%s1038_s2 + $0x38] sm:$0x1] }
  0x83   :  { %v44_v7 = vpop.permute.xlu0 %43 }
  0x84   :  { %vm45_vm0 = vcmp.eq.s32.totalorder %v41_v5, %v44_v7  ;;  %v246_v5 = vld [vmem:[%s1038_s2 + $0x20] sm:$0xff]  ;;  %v141_v7 = vld [vmem:[%s1037_s1 + $0x28] sm:$0x1] }
  0x85   :  { %v672_v8 = vsel %vm45_vm0, 1.0, %v752_v2 }
  0x86   :  { %v51_v9 = vrot.slane %v672_v8, %v50_v6  ;;  %v62_v11 = vrot.slane %v672_v8, %v61_v10  ;;  %v73_v13 = vrot.slane %v672_v8, %v72_v12  ;;  %v84_v15 = vrot.slane %v672_v8, %v83_v14 }
  0x87   :  { %v95_v17 = vrot.slane %v672_v8, %v94_v16  ;;  %v106_v19 = vrot.slane %v672_v8, %v105_v18  ;;  %v117_v21 = vrot.slane %v672_v8, %v116_v20  ;;  %v128_v23 = vrot.slane %v672_v8, %v127_v22  ;;  %v247_v8 = vld [vmem:[%s1038_s2 + $0x28] sm:$0x1]  ;;  %v142_v16 = vld [vmem:[%s1037_s1 + $0x30] sm:$0xff] }
  0x88   :  { %57 = vbcast.lane.b32.xlu1 %v51_v9, 264  ;;  %53 = vbcast.lane.b32.xlu0 %v51_v9, 256 }
  0x8c   :  { %64 = vbcast.lane.b32.xlu1 %v62_v11, 256  ;;  %68 = vbcast.lane.b32.xlu0 %v62_v11, 264 }
  0x90   :  { %75 = vbcast.lane.b32.xlu1 %v73_v13, 256  ;;  %79 = vbcast.lane.b32.xlu0 %v73_v13, 264 }
  0x94   :  { %86 = vbcast.lane.b32.xlu1 %v84_v15, 256  ;;  %90 = vbcast.lane.b32.xlu0 %v84_v15, 264 }
  0x98   :  { %97 = vbcast.lane.b32.xlu1 %v95_v17, 256  ;;  %101 = vbcast.lane.b32.xlu0 %v95_v17, 264  ;;  %v248_v17 = vld [vmem:[%s1038_s2 + $0x30] sm:$0xff] }
  0x9c   :  { %108 = vbcast.lane.b32.xlu1 %v106_v19, 256  ;;  %112 = vbcast.lane.b32.xlu0 %v106_v19, 264 }
  0xa0   :  { %119 = vbcast.lane.b32.xlu1 %v117_v21, 256  ;;  %123 = vbcast.lane.b32.xlu0 %v117_v21, 264 }
  0xa4   :  { %130 = vbcast.lane.b32.xlu1 %v128_v23, 256  ;;  %134 = vbcast.lane.b32.xlu0 %v128_v23, 264 }
  0xa8   :  { %621 = vperm.xlu1 %722, %v617_v32  }
  0xfa   :  { %v58_v37 = vpop.permute.xlu1 %57  ;;  %v54_v38 = vpop.permute.xlu0 %53 }
  0xfb   :  { %v153_v39 = vmul.f32 %v137_v33, %v58_v37  ;;  %v259_v40 = vmul.f32 %v243_v34, %v58_v37  ;;  %v152_v41 = vmul.f32 %v136_v35, %v54_v38  ;;  %v258_v42 = vmul.f32 %v242_v36, %v54_v38  ;;  %v144_v34 = vld [vmem:[%s1037_s1 + $0x40] sm:$0xff] }
  0xfc   :  { %v250_v35 = vld [vmem:[%s1038_s2 + $0x40] sm:$0xff] }
  0xfd   :  { %v171_v47 = vsel %vm170_vm3, %v153_v39, 0.0  ;;  %v277_v48 = vsel %vm276_vm4, %v259_v40, 0.0  ;;  %v169_v49 = vsel %vm168_vm5, %v152_v41, 0.0  ;;  %v275_v50 = vsel %vm274_vm6, %v258_v42, 0.0 }
  0xfe   :  { %v172_v51 = vadd.f32 %v171_v47, %v169_v49  ;;  %v278_v52 = vadd.f32 %v277_v48, %v275_v50  ;;  %v65_v53 = vpop.permute.xlu1 %64  ;;  %v69_v54 = vpop.permute.xlu0 %68 }
  0xff   :  { %v154_v55 = vmul.f32 %v138_v43, %v65_v53  ;;  %v260_v56 = vmul.f32 %v244_v44, %v65_v53  ;;  %v155_v57 = vmul.f32 %v139_v45, %v69_v54  ;;  %v261_v58 = vmul.f32 %v245_v46, %v69_v54  ;;  %v251_v53 = vld [vmem:[%s1038_s2 + $0x48] sm:$0x1] }
 0x100   :  { %v173_v59 = vrot.slane %v172_v51, 4  ;;  %v279_v60 = vrot.slane %v278_v52, 4 }
 0x101   :  { %v179_v61 = vsel %vm168_vm5, %v154_v55, 0.0  ;;  %v285_v62 = vsel %vm274_vm6, %v260_v56, 0.0  ;;  %v180_v63 = vsel %vm170_vm3, %v155_v57, 0.0  ;;  %v286_v0 = vsel %vm276_vm4, %v261_v58, 0.0  ;;  %v146_v57 = vld [vmem:[%s1037_s1 + $0x50] sm:$0xff] }
 0x102   :  { %v174_v3 = vadd.f32 %v173_v59, %v172_v51  ;;  %v280_v4 = vadd.f32 %v279_v60, %v278_v52  ;;  %v76_v6 = vpop.permute.xlu1 %75  ;;  %v80_v9 = vpop.permute.xlu0 %79  ;;  %v181_v10 = vadd.f32 %v180_v63, %v179_v61  ;;  %v287_v11 = vadd.f32 %v286_v0, %v285_v62  ;;  %v145_v52 = vld [vmem:[%s1037_s1 + $0x48] sm:$0x1]  ;;  %v252_v58 = vld [vmem:[%s1038_s2 + $0x50] sm:$0xff] }
 0x103   :  { %v156_v12 = vmul.f32 %v140_v1, %v76_v6  ;;  %v262_v13 = vmul.f32 %v246_v5, %v76_v6  ;;  %v157_v14 = vmul.f32 %v141_v7, %v80_v9  ;;  %v263_v15 = vmul.f32 %v247_v8, %v80_v9  ;;  %v147_v8 = vld [vmem:[%s1037_s1 + $0x58] sm:$0x1] }
 0x104   :  { %v175_v18 = vrot.slane %v174_v3, 2  ;;  %v281_v19 = vrot.slane %v280_v4, 2  ;;  %v182_v22 = vrot.slane %v181_v10, 4  ;;  %v288_v23 = vrot.slane %v287_v11, 4  ;;  %v253_v9 = vld [vmem:[%s1038_s2 + $0x58] sm:$0x1] }
 0x105   :  { %v188_v28 = vsel %vm168_vm5, %v156_v12, 0.0  ;;  %v294_v29 = vsel %vm274_vm6, %v262_v13, 0.0  ;;  %v189_v30 = vsel %vm170_vm3, %v157_v14, 0.0  ;;  %v295_v31 = vsel %vm276_vm4, %v263_v15, 0.0 }
 0x106   :  { %v87_v20 = vpop.permute.xlu1 %86  ;;  %v91_v21 = vpop.permute.xlu0 %90  ;;  %v176_v32 = vadd.f32 %v175_v18, %v174_v3  ;;  %v282_v33 = vadd.f32 %v281_v19, %v280_v4  ;;  %v183_v37 = vadd.f32 %v182_v22, %v181_v10  ;;  %v289_v38 = vadd.f32 %v288_v23, %v287_v11 }
 0x107   :  { %v158_v24 = vmul.f32 %v142_v16, %v87_v20  ;;  %v264_v25 = vmul.f32 %v248_v17, %v87_v20  ;;  %v159_v39 = vmul.f32 %v143_v26, %v91_v21  ;;  %v265_v40 = vmul.f32 %v249_v27, %v91_v21  ;;  %v148_v20 = vld [vmem:[%s1037_s1 + $0x60] sm:$0xff] }
 0x108   :  { %v190_v41 = vadd.f32 %v189_v30, %v188_v28  ;;  %v296_v42 = vadd.f32 %v295_v31, %v294_v29  ;;  %v177_v50 = vrot.slane %v176_v32, 1  ;;  %v283_v51 = vrot.slane %v282_v33, 1  ;;  %v254_v21 = vld [vmem:[%s1038_s2 + $0x60] sm:$0xff] }
 0x109   :  { %v197_v43 = vsel %vm168_vm5, %v158_v24, 0.0  ;;  %v303_v44 = vsel %vm274_vm6, %v264_v25, 0.0  ;;  %v198_v46 = vsel %vm170_vm3, %v159_v39, 0.0  ;;  %v304_v47 = vsel %vm276_vm4, %v265_v40, 0.0  ;;  %v255_v39 = vld [vmem:[%s1038_s2 + $0x68] sm:$0x1] }
 0x10a   :  { %v98_v36 = vpop.permute.xlu1 %97  ;;  %v102_v45 = vpop.permute.xlu0 %101  ;;  %v184_v55 = vrot.slane %v183_v37, 2  ;;  %v290_v56 = vrot.slane %v289_v38, 2  ;;  %v191_v59 = vrot.slane %v190_v41, 4  ;;  %v297_v60 = vrot.slane %v296_v42, 4 }
 0x10b   :  { %v160_v48 = vmul.f32 %v144_v34, %v98_v36  ;;  %v266_v49 = vmul.f32 %v250_v35, %v98_v36  ;;  %v199_v61 = vadd.f32 %v198_v46, %v197_v43  ;;  %v305_v62 = vadd.f32 %v304_v47, %v303_v44  ;;  %v256_v46 = vld [vmem:[%s1038_s2 + $0x70] sm:$0xff] }
 0x10c   :  { %v161_v1 = vmul.f32 %v145_v52, %v102_v45  ;;  %v267_v3 = vmul.f32 %v251_v53, %v102_v45  ;;  %v929_v4 = vadd.f32 %v177_v50, %v176_v32  ;;  %v931_v5 = vadd.f32 %v283_v51, %v282_v33  ;;  %v150_v45 = vld [vmem:[%s1037_s1 + $0x70] sm:$0xff] }
 0x10d   :  { %v206_v63 = vsel %vm168_vm5, %v160_v48, 0.0  ;;  %v312_v0 = vsel %vm274_vm6, %v266_v49, 0.0  ;;  %v939_v11 = vadd.f32 %v184_v55, %v183_v37  ;;  %v941_v12 = vadd.f32 %v290_v56, %v289_v38  ;;  %v149_v38 = vld [vmem:[%s1037_s1 + $0x68] sm:$0x1] }
 0x10e   :  { %v109_v54 = vpop.permute.xlu1 %108  ;;  %v113_v10 = vpop.permute.xlu0 %112  ;;  %v207_v13 = vsel %vm170_vm3, %v161_v1, 0.0  ;;  %v313_v14 = vsel %vm276_vm4, %v267_v3, 0.0  ;;  %v200_v16 = vrot.slane %v199_v61, 4  ;;  %v306_v17 = vrot.slane %v305_v62, 4 }
 0x10f   :  { %v162_v6 = vmul.f32 %v146_v57, %v109_v54  ;;  %v268_v7 = vmul.f32 %v252_v58, %v109_v54  ;;  %v208_v18 = vadd.f32 %v207_v13, %v206_v63  ;;  %v314_v19 = vadd.f32 %v313_v14, %v312_v0 }
 0x110   :  { %v192_v22 = vadd.f32 %v191_v59, %v190_v41  ;;  %v298_v23 = vadd.f32 %v297_v60, %v296_v42  ;;  %v163_v24 = vmul.f32 %v147_v8, %v113_v10  ;;  %v269_v25 = vmul.f32 %v253_v9, %v113_v10  ;;  %v257_v8 = vld [vmem:[%s1038_s2 + $0x78] sm:$0x1] }
 0x111   :  { %v209_v26 = vrot.slane %v208_v18, 4  ;;  %v315_v27 = vrot.slane %v314_v19, 4  ;;  %v215_v28 = vsel %vm168_vm5, %v162_v6, 0.0  ;;  %v321_v29 = vsel %vm274_vm6, %v268_v7, 0.0  ;;  %v151_v7 = vld [vmem:[%s1037_s1 + $0x78] sm:$0x1] }
 0x112   :  { %v120_v15 = vpop.permute.xlu1 %119  ;;  %v216_v30 = vsel %vm170_vm3, %v163_v24, 0.0  ;;  %v322_v31 = vsel %vm276_vm4, %v269_v25, 0.0  ;;  %v186_v34 = vrot.slane %v939_v11, 1  ;;  %v292_v35 = vrot.slane %v941_v12, 1  ;;  %v124_v40 = vpop.permute.xlu0 %123 }
 0x113   :  { %v164_v32 = vmul.f32 %v148_v20, %v120_v15  ;;  %v270_v33 = vmul.f32 %v254_v21, %v120_v15  ;;  %v201_v36 = vadd.f32 %v200_v16, %v199_v61  ;;  %v307_v37 = vadd.f32 %v306_v17, %v305_v62 }
 0x114   :  { %v193_v41 = vrot.slane %v192_v22, 2  ;;  %v299_v42 = vrot.slane %v298_v23, 2  ;;  %v217_v43 = vadd.f32 %v216_v30, %v215_v28  ;;  %v323_v44 = vadd.f32 %v322_v31, %v321_v29 }
 0x115   :  { %v210_v48 = vadd.f32 %v209_v26, %v208_v18  ;;  %v316_v49 = vadd.f32 %v315_v27, %v314_v19  ;;  %v224_v50 = vsel %vm168_vm5, %v164_v32, 0.0  ;;  %v330_v51 = vsel %vm274_vm6, %v270_v33, 0.0 }
 0x116   :  { %v131_v47 = vpop.permute.xlu1 %130  ;;  %v218_v52 = vrot.slane %v217_v43, 4  ;;  %v324_v53 = vrot.slane %v323_v44, 4  ;;  %v165_v54 = vmul.f32 %v149_v38, %v124_v40  ;;  %v271_v55 = vmul.f32 %v255_v39, %v124_v40  ;;  %v135_v9 = vpop.permute.xlu0 %134 }
 0x117   :  { %v202_v56 = vrot.slane %v201_v36, 2  ;;  %v308_v57 = vrot.slane %v307_v37, 2  ;;  %v166_v58 = vmul.f32 %v150_v45, %v131_v47  ;;  %v272_v59 = vmul.f32 %v256_v46, %v131_v47 }
 0x118   :  { %v219_v60 = vadd.f32 %v218_v52, %v217_v43  ;;  %v325_v61 = vadd.f32 %v324_v53, %v323_v44  ;;  %v225_v62 = vsel %vm170_vm3, %v165_v54, 0.0  ;;  %v331_v63 = vsel %vm276_vm4, %v271_v55, 0.0 }
 0x119   :  { %v211_v0 = vrot.slane %v210_v48, 2  ;;  %v317_v1 = vrot.slane %v316_v49, 2  ;;  %v226_v3 = vadd.f32 %v225_v62, %v224_v50  ;;  %v332_v6 = vadd.f32 %v331_v63, %v330_v51 }
 0x11a   :  { %v194_v10 = vadd.f32 %v193_v41, %v192_v22  ;;  %v300_v13 = vadd.f32 %v299_v42, %v298_v23  ;;  %v220_v14 = vrot.slane %v219_v60, 2  ;;  %v326_v15 = vrot.slane %v325_v61, 2 }
 0x11b   :  { %v203_v16 = vadd.f32 %v202_v56, %v201_v36  ;;  %v309_v17 = vadd.f32 %v308_v57, %v307_v37  ;;  %v227_v18 = vrot.slane %v226_v3, 4  ;;  %v333_v19 = vrot.slane %v332_v6, 4 }
 0x11c   :  { %v233_v20 = vsel %vm168_vm5, %v166_v58, 0.0  ;;  %v339_v21 = vsel %vm274_vm6, %v272_v59, 0.0  ;;  %v167_v24 = vmul.f32 %v151_v7, %v135_v9  ;;  %v273_v25 = vmul.f32 %v257_v8, %v135_v9 }
 0x11d   :  { %v212_v26 = vadd.f32 %v211_v0, %v210_v48  ;;  %v318_v27 = vadd.f32 %v317_v1, %v316_v49  ;;  %v228_v28 = vadd.f32 %v227_v18, %v226_v3  ;;  %v334_v29 = vadd.f32 %v333_v19, %v332_v6 }
 0x11e   :  { %v221_v22 = vadd.f32 %v220_v14, %v219_v60  ;;  %v327_v23 = vadd.f32 %v326_v15, %v325_v61  ;;  %v234_v30 = vsel %vm170_vm3, %v167_v24, 0.0  ;;  %v340_v31 = vsel %vm276_vm4, %v273_v25, 0.0 }
 0x11f   :  { %v229_v32 = vrot.slane %v228_v28, 2  ;;  %v335_v33 = vrot.slane %v334_v29, 2  ;;  %v235_v36 = vadd.f32 %v234_v30, %v233_v20  ;;  %v341_v37 = vadd.f32 %v340_v31, %v339_v21  ;;  %v539_v21 = vld [vmem:[%s1043_s7] sm:$0x7f] }
 0x120   :  { %v195_v38 = vrot.slane %v194_v10, 1  ;;  %v301_v39 = vrot.slane %v300_v13, 1  ;;  %v204_v40 = vrot.slane %v203_v16, 1  ;;  %v310_v41 = vrot.slane %v309_v17, 1 }
 0x121   :  { %v230_v42 = vadd.f32 %v229_v32, %v228_v28  ;;  %v336_v43 = vadd.f32 %v335_v33, %v334_v29  ;;  %v236_v44 = vrot.slane %v235_v36, 4  ;;  %v342_v45 = vrot.slane %v341_v37, 4 }
 0x122   :  { %v187_v46 = vadd.f32 %v186_v34, %v939_v11  ;;  %v293_v47 = vadd.f32 %v292_v35, %v941_v12  ;;  %v213_v48 = vrot.slane %v212_v26, 1  ;;  %v319_v49 = vrot.slane %v318_v27, 1 }
 0x123   :  { %v222_v50 = vrot.slane %v221_v22, 1  ;;  %v328_v51 = vrot.slane %v327_v23, 1  ;;  %v237_v52 = vadd.f32 %v236_v44, %v235_v36  ;;  %v343_v53 = vadd.f32 %v342_v45, %v341_v37 }
 0x124   :  { %v196_v54 = vadd.f32 %v195_v38, %v194_v10  ;;  %v302_v55 = vadd.f32 %v301_v39, %v300_v13  ;;  %v231_v56 = vrot.slane %v230_v42, 1  ;;  %v337_v57 = vrot.slane %v336_v43, 1  ;;  %v679_v38 = vld [vmem:[%s1045_s9] ss:$0 sm:$0xff] }
 0x125   :  { %v205_v58 = vadd.f32 %v204_v40, %v203_v16  ;;  %v311_v59 = vadd.f32 %v310_v41, %v309_v17  ;;  %v238_v60 = vrot.slane %v237_v52, 2  ;;  %v344_v61 = vrot.slane %v343_v53, 2 }
 0x126   :  { %v362_v11 = vsel %vm361_vm7, %v293_v47, %v931_v5  ;;  %v459_v12 = vsel %vm361_vm7, %v187_v46, %v929_v4  ;;  %v214_v34 = vadd.f32 %v213_v48, %v212_v26  ;;  %v320_v35 = vadd.f32 %v319_v49, %v318_v27  ;;  %v538_v26 = vld [vmem:[%s1039_s3] sm:$0xff] }
 0x127   :  { %v223_v62 = vadd.f32 %v222_v50, %v221_v22  ;;  %v329_v63 = vadd.f32 %v328_v51, %v327_v23  ;;  %v239_v0 = vadd.f32 %v238_v60, %v237_v52  ;;  %v345_v1 = vadd.f32 %v344_v61, %v343_v53  ;;  %v622_v27 = vpop.permute.xlu1 %621  ;;  %v678_v22 = vld [vmem:[%s1044_s8] ss:$0 sm:$0xff]  ;;  %s755_s8 = smov [#allocation2]  }
 0x128   :  { %v338_v3 = vadd.f32 %v337_v57, %v336_v43  ;;  %v364_v6 = vsel %vm363_vm8, %v302_v55, %v362_v11  ;;  %v232_v7 = vadd.f32 %v231_v56, %v230_v42  ;;  %v460_v8 = vsel %vm363_vm8, %v196_v54, %v459_v12  ;;  %s664_s9 = sshll.u32 %s755_s8, 4  ;;  %s665_s9 = int_to_ptr.vmem [resolvable:$true] %s664_s9 }
 0x129   :  { %v346_v9 = vrot.slane %v345_v1, 1  ;;  %v366_v10 = vsel %vm365_vm9, %v311_v59, %v364_v6  ;;  %v240_v13 = vrot.slane %v239_v0, 1  ;;  %v461_v5 = vsel %vm365_vm9, %v205_v58, %v460_v8  ;;  %p732_p1 = scmp.lt.s32.totalorder %s665_s9, %s665_s9 }
 0x12a   :  { %v368_v4 = vsel %vm367_vm10, %v320_v35, %v366_v10  ;;  %v462_v14 = vsel %vm367_vm10, %v214_v34, %v461_v5  ;;  %v630_v32 = vmul.f32 %v678_v22, %v622_v27 }
 0x12b   :  { %v347_v15 = vadd.f32 %v346_v9, %v345_v1  ;;  %v370_v16 = vsel %vm369_vm11, %v329_v63, %v368_v4  ;;  %v241_v17 = vadd.f32 %v240_v13, %v239_v0  ;;  %v463_v18 = vsel %vm369_vm11, %v223_v62, %v462_v14 }
 0x12c   :  { %v372_v19 = vsel %vm371_vm12, %v338_v3, %v370_v16  ;;  %v464_v20 = vsel %vm371_vm12, %v232_v7, %v463_v18 }
 0x12d   :  { %v374_v24 = vsel %vm373_vm13, %v347_v15, %v372_v19  ;;  %v465_v25 = vsel %vm373_vm13, %v241_v17, %v464_v20 }
 0x12e   :  { %692 = vmatmul.mubr.msk.f32.vlgmr.msra.gmra.mrb[0].mxu0 %vm274_vm6, %v374_v24  ;;  %703 = vmatmul.mubr.msk.f32.vlgmr.msra.gmra.mrb[0].mxu1 %vm168_vm5, %v465_v25 }
 0x12f   :  { %706 = vmatpush3.msk.msra.mxu0 %vm377_vm1, %v539_v21  ;;  %707 = vmatprep.mubr.msk.f32.mxu0 %vm754_vm2, %v752_v2  ;;  %v640_v2 = vld [vmem:[%s1046_s10] sm:$0xff]  ;;  %s727_s10 = scalar_lea.vmem %s665_s9, 128 }
 0x130   :  { %v641_v40 = vmul.f32 -1e+30, %v640_v2  ;;  %v655_v52 = vsub.f32 1.0, %v640_v2  ;;  %p728_p0 = scmp.ne.s32.totalorder %s665_s9, %s727_s10  ;;  %p733_p2 = scmp.lt.s32.totalorder %s727_s10, %s727_s10 }
 0x132   :  { %708 = vmatmul.mubr.msk.f32.vlgmr.msra.gmra.mrb[2].mxu0 %vm274_vm6, %v538_v26  ;;  %p734_p3 = por %p733_p2, %p732_p1 }
 0x134   :  { %p735_p4 = pnand %p734_p3, %p728_p0 }
 0x201   :  { %v447_v28 = vpop.f32.mrb[0].mxu0  ;;  %v534_v29 = vpop.f32.mrb[0].mxu1 }
 0x202   :  { %v535_v23 = vadd.f32 %v534_v29, %v447_v28  ;;  %v693_v30 = vpop.f32.mrb[1].mxu0  ;;  %v704_v31 = vpop.f32.mrb[1].mxu1 }
 0x205   :  { %v612_v33 = vpop.f32.mrb[2].mxu0 }
 0x206   :  { %v616_v36 = vadd.f32 %v612_v33, %v535_v23  ;;  %v709_v37 = vpop.f32.mrb[3].mxu0 }
 0x208   :  { %v631_v39 = vadd.f32 %v630_v32, %v616_v36 }
 0x20a   :  { %v639_v41 = vadd.f32 %v679_v38, %v631_v39 }
 0x20c   :  { %v642_v42 = vadd.f32 %v641_v40, %v639_v41 }
 0x20e   :  { %643 = vmax.xlane.f32.xlu0 %v642_v42 }
 0x29b   :  { %v644_v43 = vpop.xlane.xlu0 %643 }
 0x29c   :  { %v645_v44 = vsub.f32 %v642_v42, %v644_v43 }
 0x29e   :  { %v646_v45 = vmul.f32 1.442695, %v645_v44 }
 0x2a0   :  { %723 = vpow2.f32 %v646_v45 }
 0x2aa   :  { %v724_v46 = vpop.eup %723 }
 0x2ab   :  { %648 = vadd.xlane.f32.xlu1 %v724_v46 }
 0x338   :  { %v649_v47 = vpop.xlane.xlu1 %648 }
 0x339   :  { %725 = vrcp.f32 %v649_v47 }
 0x343   :  { %v726_v48 = vpop.eup %725 }
 0x344   :  { %v651_v49 = vmul.f32 %v726_v48, %v649_v47 }
 0x346   :  { %v652_v50 = vsub.f32 2.0, %v651_v49 }
 0x348   :  { %v653_v51 = vmul.f32 %v726_v48, %v652_v50 }
 0x34a   :  { %v654_v53 = vmul.f32 %v724_v46, %v653_v51 }
 0x34c   :  { %v656_v54 = vmul.f32 %v655_v52, %v654_v53 }
 0x34e   :  { %657 = vst [vmem:[#allocation2] sm:$0xff] %v656_v54 }
 0x34f   :  { %738 = shalt.err (!%p735_p4)
}
 0x350   :  { %s739_s12 = scalar_lea.hbm %s1047_s11, 128 }
 0x351   :  { %p740_p5 = scmp.ne.s32.totalorder %s1047_s11, %s739_s12  ;;  %p743_p6 = scmp.lt.u32.totalorder %s739_s12, %s1047_s11 }
 0x353   :  { %p745_p7 = pnand %p743_p6, %p740_p5 }
 0x355   :  { %748 = shalt.err (!%p745_p7)
}
 0x356   :  { %667 = dma.vmem_to_hbm [thread:$0]  %s665_s9, 128, %s1047_s11, [#allocation3]  }
 0x357   :  { %749 = dma.done.wait [#allocation3], 128  }
 0x358   :  { %750 = vsyncadd [#allocation3], 4294967168 }
 0x359   :  { %671 = vsyncpa [#allocation3], 1 }

</bundles_post_ra>
